<compile_context>
chip_gen: v7x
topology: tpu7x:2x2x1
jax: 0.10.0
libtpu: 0.0.40
codegen_flags: <defaults>
</compile_context>

<pallas_src>
import jax
import jax.numpy as jnp
from jax.experimental import pallas as pl
from jax.experimental.pallas import tpu as pltpu


def _gating_kernel(ab_ref, x_ref, o_ref):
    # ab_ref: SMEM f32[2] = [alpha, beta]; scalar math stays on the scalar unit.
    a = ab_ref[0]
    t = ab_ref[0] * ab_ref[1]            # alpha * beta (scalar slot)
    y = a * x_ref[...] - t               # VPU: mul + sub (f32 compute)
    o_ref[...] = jnp.clip(y, 0.0, 1.0).astype(o_ref.dtype)


def _choose_tiles(M, N, itemsize, target_bytes):
    """Pick (tile_m, tile_n) with ~target_bytes per tile, lane/sublane aligned."""
    # Lane (last) dim: full N if a single row fits the budget, else block in
    # multiples of 128 to keep stores lane-dense (unmasked vst).
    if N * itemsize <= target_bytes:
        tile_n = N
    else:
        tile_n = max(128, (target_bytes // itemsize // 128) * 128)
        tile_n = min(tile_n, N)
    rows = max(1, target_bytes // (tile_n * itemsize))
    if rows >= M:
        tile_m = M                        # full extent is always a legal block dim
    else:
        tile_m = max(8, (rows // 8) * 8)  # multiple of 8 (sublane)
    return tile_m, tile_n


def learnable_relatedness_gating(relness, alpha, beta, *,
                                 target_tile_bytes=2 * 1024 * 1024):
    """relness: float array (1-D, 2-D, or N-D); alpha, beta: f32[1] parameters."""
    orig_shape = relness.shape
    # Work on a 2-D [M, N] view (last dim -> lane axis).
    if relness.ndim == 1:
        x2d = relness.reshape(1, -1)
    elif relness.ndim == 2:
        x2d = relness
    else:
        x2d = relness.reshape(-1, relness.shape[-1])
    M, N = x2d.shape
    itemsize = jnp.dtype(x2d.dtype).itemsize

    tile_m, tile_n = _choose_tiles(M, N, itemsize, target_tile_bytes)
    grid = (pl.cdiv(M, tile_m), pl.cdiv(N, tile_n))

    # Fold the two scalar params into one tiny SMEM operand.
    ab = jnp.concatenate([alpha, beta]).astype(jnp.float32)

    out2d = pl.pallas_call(
        _gating_kernel,
        out_shape=jax.ShapeDtypeStruct((M, N), x2d.dtype),
        grid=grid,
        in_specs=[
            pl.BlockSpec(memory_space=pltpu.SMEM),              # [alpha, beta]
            pl.BlockSpec((tile_m, tile_n), lambda i, j: (i, j)),
        ],
        out_specs=pl.BlockSpec((tile_m, tile_n), lambda i, j: (i, j)),
        compiler_params=pltpu.CompilerParams(
            dimension_semantics=("parallel", "parallel"),
        ),
    )(ab, x2d)

    return out2d.reshape(orig_shape)


def reference(relness, alpha, beta):
    a = alpha[0].astype(jnp.float32)
    b = beta[0].astype(jnp.float32)
    y = jnp.clip(a * relness.astype(jnp.float32) - a * b, 0.0, 1.0)
    return y.astype(relness.dtype)


if __name__ == "__main__":
    key = jax.random.PRNGKey(0)
    k1, k2, k3 = jax.random.split(key, 3)

    # Deterministic parameters (mirrors cfg LEARNABLE_SCALING_WEIGHT = (1.3, 0.6)).
    alpha = jnp.array([1.3], dtype=jnp.float32)   # requires_grad=True in torch
    beta = jnp.array([0.6], dtype=jnp.float32)    # requires_grad=False in torch
    # TODO(synk): gradient/training path for alpha is handled by JAX autodiff
    # of the wrapper, not inside the kernel.

    # Test 1: typical small relatedness matrix (single block covers it).
    r1 = jax.random.uniform(k1, (16, 128), dtype=jnp.float32)
    o1 = jax.block_until_ready(learnable_relatedness_gating(r1, alpha, beta))
    ref1 = reference(r1, alpha, beta)
    assert o1.shape == ref1.shape and o1.dtype == ref1.dtype
    assert jnp.max(jnp.abs(o1 - ref1)) < 1e-6

    # Test 2: ragged M / non-128 N with a tiny tile budget to exercise the
    # multi-step grid and Pallas's ragged last-block handling.
    r2 = jax.random.uniform(k2, (200, 384), dtype=jnp.float32)
    o2 = jax.block_until_ready(
        learnable_relatedness_gating(r2, alpha, beta,
                                     target_tile_bytes=128 * 1024))
    ref2 = reference(r2, alpha, beta)
    assert jnp.max(jnp.abs(o2 - ref2)) < 1e-6

    # Test 3: bf16 I/O (halves HBM traffic; compute in f32 inside the kernel).
    r3 = jax.random.uniform(k3, (64, 256), dtype=jnp.float32).astype(jnp.bfloat16)
    o3 = jax.block_until_ready(learnable_relatedness_gating(r3, alpha, beta))
    ref3 = reference(r3, alpha, beta)
    assert o3.dtype == jnp.bfloat16
    assert jnp.max(jnp.abs(o3.astype(jnp.float32) - ref3.astype(jnp.float32))) < 1e-2

    print("KERNEL_OK")
</pallas_src>

<mosaic_0001>
module attributes {stable_mosaic.version = 11 : i64} {
  func.func @_gating_kernel(%arg0: i32, %arg1: i32, %arg2: memref<2xf32, #tpu.memory_space<smem>>, %arg3: memref<16x128xf32, #tpu.memory_space<vmem>>, %arg4: memref<16x128xf32, #tpu.memory_space<vmem>>) attributes {dimension_semantics = [#tpu.dimension_semantics<parallel>, #tpu.dimension_semantics<parallel>], iteration_bounds = array<i64: 1, 1>, scalar_prefetch = 0 : i64, scratch_operands = 0 : i64, tpu.core_type = #tpu.core_type<tc>, window_params = [{transform_indices = @transform_0, window_bounds = array<i64: 2>}, {transform_indices = @transform_1, window_bounds = array<i64: 16, 128>}, {transform_indices = @transform_2, window_bounds = array<i64: 16, 128>}]} {
    %c0 = arith.constant 0 : index
    %0 = memref.load %arg2[%c0] : memref<2xf32, #tpu.memory_space<smem>>
    %c0_0 = arith.constant 0 : index
    %1 = memref.load %arg2[%c0_0] : memref<2xf32, #tpu.memory_space<smem>>
    %c1 = arith.constant 1 : index
    %2 = memref.load %arg2[%c1] : memref<2xf32, #tpu.memory_space<smem>>
    %3 = arith.mulf %1, %2 : f32
    %c0_1 = arith.constant 0 : index
    %c0_2 = arith.constant 0 : index
    %4 = vector.load %arg3[%c0_1, %c0_2] : memref<16x128xf32, #tpu.memory_space<vmem>>, vector<16x128xf32>
    %5 = vector.broadcast %0 : f32 to vector<16x128xf32>
    %6 = arith.mulf %5, %4 : vector<16x128xf32>
    %7 = vector.broadcast %3 : f32 to vector<16x128xf32>
    %8 = arith.subf %6, %7 : vector<16x128xf32>
    %cst = arith.constant 0.000000e+00 : f32
    %cst_3 = arith.constant 1.000000e+00 : f32
    %9 = vector.broadcast %cst : f32 to vector<16x128xf32>
    %10 = arith.maximumf %9, %8 : vector<16x128xf32>
    %11 = vector.broadcast %cst_3 : f32 to vector<16x128xf32>
    %12 = arith.minimumf %11, %10 : vector<16x128xf32>
    %c0_4 = arith.constant 0 : index
    %c0_5 = arith.constant 0 : index
    %13 = vector.load %arg4[%c0_4, %c0_5] : memref<16x128xf32, #tpu.memory_space<vmem>>, vector<16x128xf32>
    tpu.vector_store %arg4[%c0_4, %c0_5], %12 {strides = array<i32>} : memref<16x128xf32, #tpu.memory_space<vmem>>, vector<16x128xf32>,
    return
  }
  func.func @transform_0(%arg0: i32, %arg1: i32) -> i32 {
    %c0_i32 = arith.constant 0 : i32
    %c0_i32_0 = arith.constant 0 : i32
    return %c0_i32 : i32
  }
  func.func @transform_1(%arg0: i32, %arg1: i32) -> (i32, i32) {
    %c0_i32 = arith.constant 0 : i32
    return %arg0, %arg1 : i32, i32
  }
  func.func @transform_2(%arg0: i32, %arg1: i32) -> (i32, i32) {
    %c0_i32 = arith.constant 0 : i32
    return %arg0, %arg1 : i32, i32
  }
}

</mosaic_0001>

<bundles_post_ra>
// kernel: tpu_custom_call.1
= control target key start
LH: loop header
LB: loop body
LE: loop exit
PB: predicated region body
PF: predicated region fallthrough
CT: control target
= control target key end

     0   :  { %7 = vsyncpa [#allocation5], 0  ;;  %s200_s0 = inlined_call_operand.hbm [shape: f32[2], index: 0, kind: input, shape index: {}]   ;;  %s201_s1 = inlined_call_operand.hbm [shape: f32[16,128], index: 1, kind: input, shape index: {}]   ;;  %s202_s2 = inlined_call_operand.hbm [shape: f32[16,128], index: 2, kind: output, shape index: {}]  }
   0x1   :  { %8 = vsyncpa [#allocation3], 0 }
   0x2   :  { %9 = vsyncpa [#allocation4], 0  ;;  %s78_s11 = scalar_lea.hbm %s200_s0, 16 }
   0x3   :  { %p79_p0 = scmp.ne.s32.totalorder %s200_s0, %s78_s11  ;;  %p82_p1 = scmp.lt.u32.totalorder %s78_s11, %s200_s0 }
   0x5   :  { %p84_p2 = pnand %p82_p1, %p79_p0 }
   0x7   :  { %87 = shalt.err (!%p84_p2)
}
   0x8   :  { %s138_s16 = smov [#allocation2]   ;;  %s139_s19 = smov [#allocation6]  }
   0x9   :  { %17 = dma.hbm_to_smem %s200_s0, 16, %s138_s16, [#allocation5]  }
   0xa   :  { %s23_s20 = sshll.u32 %s139_s19, 4  ;;  %s88_s23 = scalar_lea.hbm %s201_s1, 256  ;;  %s24_s20 = int_to_ptr.vmem [resolvable:$true] %s23_s20 }
   0xb   :  { %p89_p3 = scmp.ne.s32.totalorder %s201_s1, %s88_s23  ;;  %p92_p4 = scmp.lt.u32.totalorder %s88_s23, %s201_s1 }
   0xd   :  { %p94_p5 = pnand %p92_p4, %p89_p3 }
   0xf   :  { %97 = shalt.err (!%p94_p5)
}
  0x10   :  { %s98_s28 = scalar_lea.vmem %s24_s20, 256  ;;  %p103_p7 = scmp.lt.s32.totalorder %s24_s20, %s24_s20 }
  0x11   :  { %p99_p6 = scmp.ne.s32.totalorder %s24_s20, %s98_s28  ;;  %p104_p8 = scmp.lt.s32.totalorder %s98_s28, %s98_s28 }
  0x13   :  { %p105_p9 = por %p104_p8, %p103_p7 }
  0x15   :  { %p106_p10 = pnand %p105_p9, %p99_p6 }
  0x17   :  { %109 = shalt.err (!%p106_p10)
}
  0x18   :  { %s140_s0 = smov 128   ;;  %s141_s29 = smov 8  }
  0x19   :  { %29 = dma.hbm_to_vmem [thread:$0]  %s201_s1, 256, %s24_s20, [#allocation3], %s140_s0, %s140_s0, %s141_s29  }
  0x1a   :  { %132 = dma.done.wait [#allocation5], 16  }
  0x1b   :  { %133 = vsyncadd [#allocation5], 4294967280 }
  0x1c   :  { %134 = dma.done.wait [#allocation3], 256  }
  0x1d   :  { %135 = vsyncadd [#allocation3], 4294967040 }
  0x1e   :  { %36 = sfence }
  0x1f   :  { %s37_s4 = sld [smem:[#allocation2]]  ;;  %s72_s5 = sld [smem:[#allocation2 + $0x1]]  ;;  %v40_v0 = vld [vmem:[#allocation6] sm:$0xff]  ;;  %v41_v1 = vld [vmem:[#allocation6 + $0x8] sm:$0xff] }
  0x20   :  { %s142_s7 = smov [#allocation7]  }
  0x21   :  { %s59_s8 = sshll.u32 %s142_s7, 4  ;;  %s60_s8 = int_to_ptr.vmem [resolvable:$true] %s59_s8 }
  0x22   :  { %s110_s1 = scalar_lea.vmem %s60_s8, 256  ;;  %p115_p12 = scmp.lt.s32.totalorder %s60_s8, %s60_s8 }
  0x23   :  { %p111_p11 = scmp.ne.s32.totalorder %s60_s8, %s110_s1  ;;  %p116_p13 = scmp.lt.s32.totalorder %s110_s1, %s110_s1 }
  0x25   :  { %s39_s6 = smul.f32 %s72_s5, %s37_s4  ;;  %v42_v2 = vstv %s37_s4  ;;  %p117_p0 = por %p116_p13, %p115_p12 }
  0x26   :  { %v43_v3 = vmul.f32 %v42_v2, %v40_v0  ;;  %v44_v4 = vmul.f32 %v42_v2, %v41_v1 }
  0x27   :  { %v45_v5 = vstv %s39_s6  ;;  %p118_p1 = pnand %p117_p0, %p111_p11 }
  0x28   :  { %v46_v6 = vsub.f32 %v43_v3, %v45_v5  ;;  %v47_v7 = vsub.f32 %v44_v4, %v45_v5 }
  0x2a   :  { %v48_v8 = vmax.f32 %v46_v6, 0.0  ;;  %v49_v9 = vmax.f32 %v47_v7, 0.0 }
  0x2c   :  { %v50_v10 = vmin.f32 %v48_v8, 1.0  ;;  %v51_v11 = vmin.f32 %v49_v9, 1.0 }
  0x2e   :  { %52 = vst [vmem:[#allocation7] sm:$0xff] %v50_v10  ;;  %53 = vst [vmem:[#allocation7 + $0x8] sm:$0xff] %v51_v11 }
  0x2f   :  { %121 = shalt.err (!%p118_p1)
}
  0x30   :  { %s122_s11 = scalar_lea.hbm %s202_s2, 256 }
  0x31   :  { %p123_p2 = scmp.ne.s32.totalorder %s202_s2, %s122_s11  ;;  %p126_p3 = scmp.lt.u32.totalorder %s122_s11, %s202_s2 }
  0x33   :  { %p128_p4 = pnand %p126_p3, %p123_p2 }
  0x35   :  { %131 = shalt.err (!%p128_p4)
}
  0x36   :  { %65 = dma.vmem_to_hbm [thread:$0]  %s60_s8, 256, %s202_s2, [#allocation4], %s140_s0, %s140_s0, %s141_s29  }
  0x37   :  { %136 = dma.done.wait [#allocation4], 256  }
  0x38   :  { %137 = vsyncadd [#allocation4], 4294967040 }
  0x39   :  { %69 = vsyncpa [#allocation3], 1 }
  0x3a   :  { %70 = vsyncpa [#allocation4], 1 }
  0x3b   :  { %71 = vsyncpa [#allocation5], 1 }

</bundles_post_ra>
